<compile_context>
chip_gen: v7x
topology: tpu7x:2x2x1
jax: 0.10.0
libtpu: 0.0.40
codegen_flags: <defaults>
</compile_context>

<pallas_src>
import functools

import jax
import jax.numpy as jnp
from jax.experimental import pallas as pl
from jax.experimental.pallas import tpu as pltpu


def _round_up(x, m):
    return (x + m - 1) // m * m


def _weight_norm(v, g):
    # torch.nn.utils.weight_norm(dim=0): per output channel, norm over the rest.
    norm = jnp.sqrt(jnp.sum(v * v, axis=(1, 2), keepdims=True))
    return g * v / norm


def _vmem_capacity_bytes():
    """Per-TensorCore VMEM capacity; conservative fallback if unavailable."""
    try:
        return int(pltpu.get_tpu_info().vmem_capacity_bytes)
    except Exception:
        return 64 * 1024 * 1024        # v7x-sized, safe everywhere


def _choose_tiling(length, in_c_p, out_c_p, k, ncat, x_bytes, out_bytes,
                   budget_bytes, in_buffers=2, weight_bufs=2):
    """Pick an L tile (multiple of 128): minimize padded length, prefer bigger
    tiles, and keep the full per-step VMEM footprint within budget_bytes."""
    fixed = (weight_bufs * ncat * out_c_p * k * in_c_p * x_bytes  # fused weights
             + 2 * ncat * out_c_p * 4                             # bias (f32)
             + in_c_p * 128 * x_bytes)                            # halo carry
    best = None
    for tl in (1024, 768, 512, 384, 256, 128):
        l_pad = _round_up(length, tl)
        per_tl = (in_buffers * in_c_p * tl * x_bytes    # pipelined input blocks
                  + 2 * out_c_p * tl * out_bytes        # pipelined output blocks
                  + k * in_c_p * tl * x_bytes           # im2col scratch
                  + (ncat + 2) * out_c_p * tl * 4)      # f32 acc / gate temps
        if fixed + per_tl > budget_bytes:
            continue
        score = (l_pad, -tl)
        if best is None or score < best[0]:
            best = (score, tl, l_pad)
    if best is None:                                    # huge channels: min tile
        return 128, _round_up(length, 128)
    return best[1], best[2]


def _glu_kernel(k, tl, in_c_p, out_c_p, ncat, fast_sigmoid,
                x_ref, w_ref, b_ref, out_ref, halo_ref, xcol_ref):
    """One grid step = one (batch, L-tile) pair.

    x_ref   : (1, in_c_p, tl)            input tile (compute dtype, no halo)
    w_ref   : (ncat*out_c_p, k*in_c_p)   fused + flattened conv weights
    b_ref   : (ncat*out_c_p, 1)          fused biases (f32)
    out_ref : (1, out_c_p, tl)           output tile (x.dtype, lane-dense)
    halo_ref: (in_c_p, max(k-1, 1))      carried left halo (prev tile's last
                                         k-1 columns; zeros at lt == 0)
    xcol_ref: (k*in_c_p, tl)             im2col scratch
    """
    lt = pl.program_id(1)
    tile = x_ref[0]                                        # (in_c_p, tl)

    if k > 1:
        @pl.when(lt == 0)
        def _():                                           # causal zero left pad
            halo_ref[...] = jnp.zeros_like(halo_ref)
        halo = halo_ref[...]                               # (in_c_p, k-1)

    # im2col band writes: row band t = causal window shifted by tap t.
    for t in range(k):
        left = k - 1 - t                                   # halo cols in band t
        r0, r1 = t * in_c_p, (t + 1) * in_c_p
        if left > 0:
            xcol_ref[r0:r1, :left] = halo[:, t:]
            xcol_ref[r0:r1, left:] = tile[:, :tl - left]
        else:
            xcol_ref[r0:r1, :] = tile

    if k > 1:
        # Carry the right edge of this tile as the next tile's left halo.
        halo_ref[...] = tile[:, tl - (k - 1):]

    # Single fused MXU matmul (both gates + optional residual proj), f32 acc.
    acc = jnp.dot(w_ref[...], xcol_ref[...],
                  preferred_element_type=jnp.float32)
    acc = acc + b_ref[...]                                 # (ncat*out_c_p, tl)

    x1 = acc[:out_c_p]
    x2 = acc[out_c_p:2 * out_c_p]
    if ncat == 3:                                          # 1x1 residual proj
        resid = acc[2 * out_c_p:]
    else:                                                  # identity residual
        resid = tile[:out_c_p].astype(jnp.float32)

    if fast_sigmoid:
        gate = pl.reciprocal(1.0 + jnp.exp(-x2), approx=True)   # EUP path
    else:
        gate = jax.nn.sigmoid(x2)

    out_ref[0] = (x1 * gate + resid).astype(out_ref.dtype)


def glu_block_1d(x, params, k, compute_dtype=jnp.float32, fast_sigmoid=None,
                 input_buffers=2):
    """GLUblock_1D forward. x: (B, in_c, L) -> (B, out_c, L) in x.dtype."""
    B, in_c, L = x.shape
    out_c = params["v1"].shape[0]
    use_proj = in_c != out_c
    ncat = 3 if use_proj else 2

    compute_dtype = jnp.dtype(compute_dtype)
    out_dtype = jnp.dtype(x.dtype)
    is_bf16 = compute_dtype == jnp.dtype(jnp.bfloat16)
    if fast_sigmoid is None:
        fast_sigmoid = is_bf16                 # keep the f32 path exact
    x_bytes = compute_dtype.itemsize
    out_bytes = out_dtype.itemsize

    in_c_p = _round_up(in_c, 16 if is_bf16 else 8)
    out_c_p = _round_up(out_c, 16 if out_dtype == jnp.dtype(jnp.bfloat16) else 8)

    # --- per-chip VMEM budget (v7x: 64 MiB/TC, v5e/v6e: 128 MiB). ---
    vmem_cap = _vmem_capacity_bytes()
    vmem_limit = int(min(vmem_cap // 2, 64 * 1024 * 1024))
    budget = (vmem_limit * 3) // 4

    w_block_bytes = ncat * out_c_p * k * in_c_p * x_bytes
    single_buffer_w = w_block_bytes >= (2 << 20)   # constant block: 1 buffer
    weight_bufs = 1 if single_buffer_w else 2

    tl, l_pad = _choose_tiling(L, in_c_p, out_c_p, k, ncat, x_bytes, out_bytes,
                               budget, in_buffers=input_buffers,
                               weight_bufs=weight_bufs)
    n_tiles = l_pad // tl

    # ---- weight prep (XLA side): weight-norm, fuse, flatten, pad. ----
    w1 = _weight_norm(params["v1"], params["g1"])          # (out_c, in_c, k)
    w2 = _weight_norm(params["v2"], params["g2"])
    ws = [w1, w2]
    bs = [params["b1"], params["b2"]]
    if use_proj:
        wr = _weight_norm(params["vr"], params["gr"])      # (out_c, in_c, 1)
        # 1x1 conv acts on the "current" position == tap (k-1) of the window.
        ws.append(jnp.pad(wr, ((0, 0), (0, 0), (k - 1, 0))))
        bs.append(params["br"])

    def _flatten(w):                                       # -> (out_c_p, k*in_c_p)
        w = jnp.transpose(w, (0, 2, 1))                    # (out_c, k, in_c)
        w = jnp.pad(w, ((0, out_c_p - out_c), (0, 0), (0, in_c_p - in_c)))
        return w.reshape(out_c_p, k * in_c_p)

    w_cat = jnp.concatenate([_flatten(w) for w in ws],
                            axis=0).astype(compute_dtype)  # (ncat*out_c_p, k*in_c_p)
    b_cat = jnp.concatenate(
        [jnp.pad(b, (0, out_c_p - out_c)) for b in bs], axis=0
    ).reshape(ncat * out_c_p, 1).astype(jnp.float32)

    # ---- input prep: only channel / right-L zero pad; NO halo duplication. ----
    xp = x
    if in_c_p != in_c or l_pad != L:
        xp = jnp.pad(xp, ((0, 0), (0, in_c_p - in_c), (0, l_pad - L)))
    if xp.dtype != compute_dtype:
        xp = xp.astype(compute_dtype)

    x_kwargs = ({} if input_buffers == 2
                else dict(pipeline_mode=pl.Buffered(input_buffers)))
    w_kwargs = dict(pipeline_mode=pl.Buffered(1)) if single_buffer_w else {}

    kernel = functools.partial(_glu_kernel, k, tl, in_c_p, out_c_p, ncat,
                               fast_sigmoid)

    out = pl.pallas_call(
        kernel,
        out_shape=jax.ShapeDtypeStruct((B, out_c_p, l_pad), out_dtype),
        grid=(B, n_tiles),
        in_specs=[
            pl.BlockSpec((1, in_c_p, tl), lambda b, lt: (b, 0, lt), **x_kwargs),
            pl.BlockSpec((ncat * out_c_p, k * in_c_p), lambda b, lt: (0, 0),
                         **w_kwargs),
            pl.BlockSpec((ncat * out_c_p, 1), lambda b, lt: (0, 0)),
        ],
        out_specs=pl.BlockSpec((1, out_c_p, tl), lambda b, lt: (b, 0, lt)),
        scratch_shapes=[
            pltpu.VMEM((in_c_p, max(k - 1, 1)), compute_dtype),   # halo carry
            pltpu.VMEM((k * in_c_p, tl), compute_dtype),          # im2col
        ],
        compiler_params=pltpu.CompilerParams(
            # Batch axis may be split across TensorCores (v7x megacore); the
            # L-tile axis must stay sequential because of the halo carry.
            dimension_semantics=("parallel", "arbitrary"),
            vmem_limit_bytes=vmem_limit),
    )(xp, w_cat, b_cat)

    if out_c_p != out_c or l_pad != L:
        out = out[:, :out_c, :L]
    return out


def _reference(x, params, k):
    """Pure-JAX f32 reference matching the PyTorch GLUblock_1D forward."""
    B, in_c, L = x.shape
    out_c = params["v1"].shape[0]
    w1 = _weight_norm(params["v1"], params["g1"])
    w2 = _weight_norm(params["v2"], params["g2"])

    def conv(w, b, inp):
        kk = w.shape[-1]
        lout = inp.shape[-1] - kk + 1
        out = jnp.zeros((B, w.shape[0], lout), jnp.float32)
        for t in range(kk):
            out = out + jnp.einsum("oi,bil->bol", w[:, :, t],
                                   inp[:, :, t:t + lout],
                                   precision=jax.lax.Precision.HIGHEST)
        return out + b[None, :, None]

    xpad = jnp.pad(x, ((0, 0), (0, 0), (k - 1, 0)))
    x1 = conv(w1, params["b1"], xpad)
    x2 = conv(w2, params["b2"], xpad)
    if in_c != out_c:
        wr = _weight_norm(params["vr"], params["gr"])
        resid = conv(wr, params["br"], x)
    else:
        resid = x
    return x1 * jax.nn.sigmoid(x2) + resid


def make_params(key, k, in_c, out_c):
    ks = jax.random.split(key, 9)
    return {
        "v1": jax.random.normal(ks[0], (out_c, in_c, k), jnp.float32) * 0.3,
        "g1": jax.random.normal(ks[1], (out_c, 1, 1), jnp.float32) * 0.5 + 1.0,
        "b1": jax.random.normal(ks[2], (out_c,), jnp.float32) * 0.1,
        "v2": jax.random.normal(ks[3], (out_c, in_c, k), jnp.float32) * 0.3,
        "g2": jax.random.normal(ks[4], (out_c, 1, 1), jnp.float32) * 0.5 + 1.0,
        "b2": jax.random.normal(ks[5], (out_c,), jnp.float32) * 0.1,
        "vr": jax.random.normal(ks[6], (out_c, in_c, 1), jnp.float32) * 0.3,
        "gr": jax.random.normal(ks[7], (out_c, 1, 1), jnp.float32) * 0.5 + 1.0,
        "br": jax.random.normal(ks[8], (out_c,), jnp.float32) * 0.1,
    }


if __name__ == "__main__":
    def run_case(B, in_c, out_c, L, k, compute_dtype, tol, key):
        kx, kp = jax.random.split(key)
        x = jax.random.normal(kx, (B, in_c, L), jnp.float32)
        params = make_params(kp, k, in_c, out_c)
        fn = jax.jit(functools.partial(glu_block_1d, k=k,
                                       compute_dtype=compute_dtype))
        out = jax.block_until_ready(fn(x, params))
        ref = _reference(x, params, k)
        assert out.shape == (B, out_c, L)
        err = float(jnp.max(jnp.abs(out - ref)))
        scale = 1.0 + float(jnp.max(jnp.abs(ref)))
        assert err <= tol * scale, (err, scale, tol)

    key = jax.random.PRNGKey(0)
    k0, k1, k2 = jax.random.split(key, 3)
    # use_proj path (in_c != out_c), single L tile, exact f32 compute.
    run_case(2, 4, 8, 16, 3, jnp.float32, 1e-4, k0)
    # identity-residual path (in_c == out_c), multi-tile grid exercising the
    # carried halo across L tiles, f32 compute.
    run_case(2, 8, 8, 600, 3, jnp.float32, 1e-4, k1)
    # bf16 MXU fast path (f32 accumulation / gating), loose tolerance.
    run_case(2, 4, 8, 16, 3, jnp.bfloat16, 5e-2, k2)

    print("KERNEL_OK")
</pallas_src>

<mosaic_0001>
module attributes {stable_mosaic.version = 11 : i64} {
  func.func @_glu_kernel(%arg0: i32, %arg1: i32, %arg2: memref<1x8x128xf32, #tpu.memory_space<vmem>>, %arg3: memref<24x24xf32, #tpu.memory_space<vmem>>, %arg4: memref<24x1xf32, #tpu.memory_space<vmem>>, %arg5: memref<1x8x128xf32, #tpu.memory_space<vmem>>, %arg6: memref<8x2xf32, #tpu.memory_space<vmem>>, %arg7: memref<24x128xf32, #tpu.memory_space<vmem>>) attributes {dimension_semantics = [#tpu.dimension_semantics<parallel>, #tpu.dimension_semantics<arbitrary>], iteration_bounds = array<i64: 2, 1>, scalar_prefetch = 0 : i64, scratch_operands = 2 : i64, tpu.core_type = #tpu.core_type<tc>, window_params = [{transform_indices = @transform_0, window_bounds = array<i64: 1, 8, 128>}, {pipeline_mode = #tpu.pipeline_mode<synchronous>, transform_indices = @transform_1, window_bounds = array<i64: 24, 24>}, {pipeline_mode = #tpu.pipeline_mode<synchronous>, transform_indices = @transform_2, window_bounds = array<i64: 24, 1>}, {transform_indices = @transform_3, window_bounds = array<i64: 1, 8, 128>}]} {
    %c0 = arith.constant 0 : index
    %c0_0 = arith.constant 0 : index
    %c0_1 = arith.constant 0 : index
    %0 = vector.load %arg2[%c0, %c0_0, %c0_1] : memref<1x8x128xf32, #tpu.memory_space<vmem>>, vector<1x8x128xf32>
    %1 = vector.shape_cast %0 : vector<1x8x128xf32> to vector<8x128xf32>
    %c0_i32 = arith.constant 0 : i32
    %2 = arith.cmpi eq, %arg1, %c0_i32 : i32
    %3 = arith.extui %2 : i1 to i32
    %c0_i32_2 = arith.constant 0 : i32
    %4 = arith.cmpi ne, %3, %c0_i32_2 : i32
    scf.if %4 {
      %cst_23 = arith.constant 0.000000e+00 : f32
      %35 = vector.broadcast %cst_23 : f32 to vector<8x2xf32>
      %c0_24 = arith.constant 0 : index
      %c0_25 = arith.constant 0 : index
      %36 = vector.load %arg6[%c0_24, %c0_25] : memref<8x2xf32, #tpu.memory_space<vmem>>, vector<8x2xf32>
      tpu.vector_store %arg6[%c0_24, %c0_25], %35 {strides = array<i32>} : memref<8x2xf32, #tpu.memory_space<vmem>>, vector<8x2xf32>,
    } else {
    }
    %c0_3 = arith.constant 0 : index
    %c0_4 = arith.constant 0 : index
    %5 = vector.load %arg6[%c0_3, %c0_4] : memref<8x2xf32, #tpu.memory_space<vmem>>, vector<8x2xf32>
    %c0_5 = arith.constant 0 : index
    %c0_6 = arith.constant 0 : index
    %6 = vector.load %arg7[%c0_5, %c0_6] : memref<24x128xf32, #tpu.memory_space<vmem>>, vector<8x2xf32>
    tpu.vector_store %arg7[%c0_5, %c0_6], %5 {strides = array<i32>} : memref<24x128xf32, #tpu.memory_space<vmem>>, vector<8x2xf32>,
    %7 = vector.extract_strided_slice %1 {offsets = [0, 0], sizes = [8, 126], strides = [1, 1]} : vector<8x128xf32> to vector<8x126xf32>
    %c0_7 = arith.constant 0 : index
    %c2 = arith.constant 2 : index
    %8 = vector.load %arg7[%c0_7, %c2] : memref<24x128xf32, #tpu.memory_space<vmem>>, vector<8x126xf32>
    tpu.vector_store %arg7[%c0_7, %c2], %7 {strides = array<i32>} : memref<24x128xf32, #tpu.memory_space<vmem>>, vector<8x126xf32>,
    %9 = vector.extract_strided_slice %5 {offsets = [0, 1], sizes = [8, 1], strides = [1, 1]} : vector<8x2xf32> to vector<8x1xf32>
    %c8 = arith.constant 8 : index
    %c0_8 = arith.constant 0 : index
    %10 = vector.load %arg7[%c8, %c0_8] : memref<24x128xf32, #tpu.memory_space<vmem>>, vector<8x1xf32>
    tpu.vector_store %arg7[%c8, %c0_8], %9 {strides = array<i32>} : memref<24x128xf32, #tpu.memory_space<vmem>>, vector<8x1xf32>,
    %11 = vector.extract_strided_slice %1 {offsets = [0, 0], sizes = [8, 127], strides = [1, 1]} : vector<8x128xf32> to vector<8x127xf32>
    %c8_9 = arith.constant 8 : index
    %c1 = arith.constant 1 : index
    %12 = vector.load %arg7[%c8_9, %c1] : memref<24x128xf32, #tpu.memory_space<vmem>>, vector<8x127xf32>
    tpu.vector_store %arg7[%c8_9, %c1], %11 {strides = array<i32>} : memref<24x128xf32, #tpu.memory_space<vmem>>, vector<8x127xf32>,
    %c16 = arith.constant 16 : index
    %c0_10 = arith.constant 0 : index
    %13 = vector.load %arg7[%c16, %c0_10] : memref<24x128xf32, #tpu.memory_space<vmem>>, vector<8x128xf32>
    tpu.vector_store %arg7[%c16, %c0_10], %1 {strides = array<i32>} : memref<24x128xf32, #tpu.memory_space<vmem>>, vector<8x128xf32>,
    %14 = vector.extract_strided_slice %1 {offsets = [0, 126], sizes = [8, 2], strides = [1, 1]} : vector<8x128xf32> to vector<8x2xf32>
    %c0_11 = arith.constant 0 : index
    %c0_12 = arith.constant 0 : index
    %15 = vector.load %arg6[%c0_11, %c0_12] : memref<8x2xf32, #tpu.memory_space<vmem>>, vector<8x2xf32>
    tpu.vector_store %arg6[%c0_11, %c0_12], %14 {strides = array<i32>} : memref<8x2xf32, #tpu.memory_space<vmem>>, vector<8x2xf32>,
    %c0_13 = arith.constant 0 : index
    %c0_14 = arith.constant 0 : index
    %16 = vector.load %arg3[%c0_13, %c0_14] : memref<24x24xf32, #tpu.memory_space<vmem>>, vector<24x24xf32>
    %c0_15 = arith.constant 0 : index
    %c0_16 = arith.constant 0 : index
    %17 = vector.load %arg7[%c0_15, %c0_16] : memref<24x128xf32, #tpu.memory_space<vmem>>, vector<24x128xf32>
    %cst = arith.constant dense<0.000000e+00> : vector<24x128xf32>
    %18 = tpu.matmul %16, %17, %cst {dimension_numbers = #tpu.dot_dimension_numbers<[1], [0], [0], [1], [0, 0, 1, 1], [], []>} : vector<24x24xf32>, vector<24x128xf32>, vector<24x128xf32> -> vector<24x128xf32>
    %c0_17 = arith.constant 0 : index
    %c0_18 = arith.constant 0 : index
    %19 = vector.load %arg4[%c0_17, %c0_18] : memref<24x1xf32, #tpu.memory_space<vmem>>, vector<24x1xf32>
    %20 = vector.broadcast %19 : vector<24x1xf32> to vector<24x128xf32>
    %21 = arith.addf %18, %20 : vector<24x128xf32>
    %22 = vector.extract_strided_slice %21 {offsets = [0, 0], sizes = [8, 128], strides = [1, 1]} : vector<24x128xf32> to vector<8x128xf32>
    %23 = vector.extract_strided_slice %21 {offsets = [8, 0], sizes = [8, 128], strides = [1, 1]} : vector<24x128xf32> to vector<8x128xf32>
    %24 = vector.extract_strided_slice %21 {offsets = [16, 0], sizes = [8, 128], strides = [1, 1]} : vector<24x128xf32> to vector<8x128xf32>
    %25 = arith.negf %23 : vector<8x128xf32>
    %26 = math.exp %25 : vector<8x128xf32>
    %cst_19 = arith.constant 1.000000e+00 : f32
    %27 = vector.broadcast %cst_19 : f32 to vector<8x128xf32>
    %28 = arith.addf %27, %26 : vector<8x128xf32>
    %29 = arith.divf %27, %28 : vector<8x128xf32>
    %30 = arith.mulf %22, %29 : vector<8x128xf32>
    %31 = arith.addf %30, %24 : vector<8x128xf32>
    %c0_20 = arith.constant 0 : index
    %c0_21 = arith.constant 0 : index
    %c0_22 = arith.constant 0 : index
    %32 = vector.load %arg5[%c0_20, %c0_21, %c0_22] : memref<1x8x128xf32, #tpu.memory_space<vmem>>, vector<1x8x128xf32>
    %33 = vector.shape_cast %32 : vector<1x8x128xf32> to vector<8x128xf32>
    %34 = vector.shape_cast %31 : vector<8x128xf32> to vector<1x8x128xf32>
    tpu.vector_store %arg5[%c0_20, %c0_21, %c0_22], %34 {strides = array<i32>} : memref<1x8x128xf32, #tpu.memory_space<vmem>>, vector<1x8x128xf32>,
    return
  }
  func.func @transform_0(%arg0: i32, %arg1: i32) -> (i32, i32, i32) {
    %c0_i32 = arith.constant 0 : i32
    %c0_i32_0 = arith.constant 0 : i32
    return %arg0, %c0_i32, %arg1 : i32, i32, i32
  }
  func.func @transform_1(%arg0: i32, %arg1: i32) -> (i32, i32) {
    %c0_i32 = arith.constant 0 : i32
    %c0_i32_0 = arith.constant 0 : i32
    %c0_i32_1 = arith.constant 0 : i32
    return %c0_i32, %c0_i32_0 : i32, i32
  }
  func.func @transform_2(%arg0: i32, %arg1: i32) -> (i32, i32) {
    %c0_i32 = arith.constant 0 : i32
    %c0_i32_0 = arith.constant 0 : i32
    %c0_i32_1 = arith.constant 0 : i32
    return %c0_i32, %c0_i32_0 : i32, i32
  }
  func.func @transform_3(%arg0: i32, %arg1: i32) -> (i32, i32, i32) {
    %c0_i32 = arith.constant 0 : i32
    %c0_i32_0 = arith.constant 0 : i32
    return %arg0, %c0_i32, %arg1 : i32, i32, i32
  }
}

</mosaic_0001>

<bundles_post_ra>
// kernel: glu_block_1d.1
= control target key start
LH: loop header
LB: loop body
LE: loop exit
PB: predicated region body
PF: predicated region fallthrough
CT: control target
= control target key end

     0   :  { %8 = vsyncpa [#allocation5], 0  ;;  %s784_s0 = inlined_call_operand.vmem [shape: f32[2,8,128], index: 0, kind: input, shape index: {}]   ;;  %s785_s1 = inlined_call_operand.vmem [shape: f32[24,24], index: 1, kind: input, shape index: {}]   ;;  %s786_s2 = inlined_call_operand.vmem [shape: f32[24,1], index: 2, kind: input, shape index: {}]   ;;  %s787_s3 = inlined_call_operand.hbm [shape: f32[2,8,128], index: 3, kind: output, shape index: {}]  }
   0x1   :  { %10 = vsyncpa [#allocation5 + $0x1], 0  ;;  %s648_s12 = smov 0   ;;  %s650_s13 = smov 0  }
   0x2   :  { %s652_s14 = smov 0   ;;  %s654_s15 = smov 0  }
   0x3   :  { %s656_s16 = smov 0   ;;  %s658_s17 = smov 0  }
   0x4 LB: > { %s429_s18 = sadd.s32 4294967295, %s618_s17   ;;  %s430_s19 = sadd.s32 4294967294, %s618_s17   ;;  %s618_s17 = sphi %s658_s17, %s16_s17   ;;  %s614_s16 = sphi %s656_s16, %s794_s16   ;;  %s610_s15 = sphi %s654_s15, %s793_s15   ;;  %s606_s14 = sphi %s652_s14, %s792_s14   ;;  %s602_s13 = sphi %s650_s13, %s791_s13   ;;  %s598_s12 = sphi %s648_s12, %s790_s12  }
   0x5   : > { %s28_s20 = sadd.s32 1, %s614_s16  ;;  %s107_s21 = sadd.s32 1, %s606_s14 }
   0x6   : > { %p30_p0 = scmp.ge.s32.totalorder %s28_s20, 2  ;;  %p117_p1 = scmp.ne.s32.totalorder %s606_s14, %s602_s13 }
   0x7   : > { %p118_p2 = scmp.eq.s32.totalorder %s429_s18, 1  ;;  %p123_p3 = scmp.ne.s32.totalorder %s602_s13, %s598_s12 }
   0x8   : > { %s796_s20 = smov (%p30_p0, %s28_s20), 0  ;;  %p124_p5 = scmp.eq.s32.totalorder %s430_s19, 1 }
   0x9   : > { %p688_p4 = por %p118_p2, %p117_p1  ;;  %s102_s23 = ssub.s32 %s614_s16, %s796_s20 }
   0xa   : > { %p433_p6 = scmp.ge.s32.totalorder %s618_s17, 1  ;;  %p105_p7 = scmp.eq.s32.totalorder %s102_s23, 0 }
   0xb   : > { %p695_p8 = por %p124_p5, %p123_p3  ;;  %p158_p9 = scmp.lt.s32.totalorder %s618_s17, 3 }
   0xc   : > { %s701_s25 = scalar_select %p105_p7, %s606_s14, %s107_s21  }
   0xd   : > { %p159_p10 = pnand %p433_p6, %p158_p9 }
   0xe   : > { %vm196_vm0 = vcmask (!%p159_p10), 15360   ;;  %p184_p11 = scmp.lt.s32.totalorder (!%p159_p10), %s610_s15, 1  ;;  %v620_v0 = vmov (!%p159_p10), 0.0   ;;  %v621_v1 = vmov (!%p159_p10), 0.0|0.0   ;;  %s622_s4 = smov (!%p159_p10), 1   ;;  %vm625_vm1 = vmmov (!%p159_p10), 0  }
   0xf   : > { %162 = sbr.rel (%p159_p10) target bundleno = 416 (0x1a0), region = 32  ;;  %197 = vst.msk [vmem:[#allocation2] sm:$0xff] (!%p159_p10), %vm196_vm0, %v620_v0  ;;  %465 = vmatprep.subr.bf16.mxu0 (!%p159_p10), %v621_v1  ;;  %468 = vmatprep.subr.bf16.mxu1 (!%p159_p10), %v621_v1  ;;  %s623_s5 = smov (!%p159_p10), 127   ;;  %v227_v4 = vld [vmem:[%s786_s2 + $0x8] sm:$0xff] (!%p159_p10)  ;;  %v626_v5 = vmov (!%p159_p10), 0   ;;  %v226_v6 = vld [vmem:[%s786_s2] sm:$0xff] (!%p159_p10) }
  0x10   : > { %s624_s6 = smov (!%p159_p10), 2   ;;  %459 = vmatprep.mubr.msk.f32.mxu1 (!%p159_p10), %vm625_vm1, %v620_v0  ;;  %456 = vmatprep.mubr.msk.f32.mxu0 (!%p159_p10), %vm625_vm1, %v620_v0  ;;  %v228_v7 = vld [vmem:[%s786_s2 + $0x10] sm:$0xff] (!%p159_p10)  ;;  %vm211_vm2 = vcmask (!%p159_p10), 7168   ;;  %vm216_vm3 = vcmask (!%p159_p10), 1047560   ;;  %vm205_vm4 = vcmask (!%p159_p10), 1047568   ;;  %v221_v14 = vld [vmem:[%s785_s1 + $0x8] sm:$0xff] (!%p159_p10) }
  0x11   : > { %534 = vset.pattern.permute.xlu1 (!%p159_p10), %v626_v5  ;;  %535 = vset.pattern.permute.xlu0 (!%p159_p10), %v626_v5  ;;  %vm244_vm5 = vcmask (!%p159_p10), 195584   ;;  %v220_v15 = vld [vmem:[%s785_s1] sm:$0xff] (!%p159_p10)  ;;  %v222_v16 = vld [vmem:[%s785_s1 + $0x10] sm:$0xff] (!%p159_p10)  ;;  %s181_s29 = sand.u32 (!%p159_p10), 1, %s602_s13  }
  0x12   : > { %s344_s10 = scalar_lea.sflag (!%p159_p10), [#allocation5], %s181_s29 }
  0x16   : > { %s185_s26 = scalar_select %p184_p11, %s610_s15, 1  ;;  %v198_v3 = vld [vmem:[#allocation2] sm:$0xff] }
  0x17   : > { %208 = vrot.lane.b32.xlu0 %v198_v3, %s623_s5  ;;  %200 = vst.msk [vmem:[#allocation3] sm:$0xff] %vm196_vm0, %v198_v3 }
  0x18   : > { %s435_s27 = sshll.u32 %s185_s26, 3 }
  0x19   : > { %s190_s30 = scalar_lea.vmem %s784_s0, %s435_s27 }
  0x1a   : > { %v191_v2 = vld [vmem:[%s190_s30] sm:$0xff]  ;;  %s434_s30 = sshll.u32 %s181_s29, 3 }
  0x1b   : > { %213 = vrot.lane.b32.xlu1 %v191_v2, %s622_s4  ;;  %202 = vrot.lane.b32.xlu0 %v191_v2, %s624_s6  ;;  %s441_s4 = sshll.u32 %s610_s15, 7  ;;  %s183_s5 = scalar_lea.vmem [#allocation4], %s434_s30 }
  0x1c   : > { %s358_s6 = sshll.u32 %s183_s5, 4  ;;  %s737_s9 = scalar_lea.hbm %s787_s3, %s441_s4  ;;  %s739_s6 = int_to_ptr.vmem [resolvable:$true] %s358_s6 }
  0x1d   : > { %s540_s11 = scalar_lea.vmem %s739_s6, 128  ;;  %s627_s15 = smov [#allocation4]  }
  0x1e   : > { %p541_p12 = scmp.ne.s32.totalorder %s739_s6, %s540_s11  ;;  %s544_s18 = sshll.u32 %s627_s15, 4  ;;  %s545_s18 = int_to_ptr.vmem [resolvable:$false] %s544_s18 }
  0x1f   : > { %236 = vperm.xlu1 %534, %v227_v4   ;;  %231 = vperm.xlu0 %535, %v226_v6   ;;  %s546_s19 = scalar_lea.vmem %s545_s18, 256  ;;  %p547_p1 = scmp.lt.s32.totalorder %s739_s6, %s545_s18 }
  0x20   : > { %p542_p13 = pnand %p541_p12, %p688_p4  ;;  %p548_p2 = scmp.lt.s32.totalorder %s546_s19, %s540_s11 }
  0x22   : > { %p543_p0 = pneg %p542_p13  ;;  %p549_p3 = por %p548_p2, %p547_p1 }
  0x23   : > { %241 = vperm.xlu1 %534, %v228_v7  }
  0x24   : > { %p550_p5 = pnand %p549_p3, %p543_p0 }
  0x89   : > { %v209_v9 = vpop.permute.xlu0 %208 }
  0x8a   : > { %212 = vst.msk [vmem:[#allocation3 + $0x8] sm:$0xff] %vm211_vm2, %v209_v9 }
  0x8d   : > { %v214_v8 = vpop.permute.xlu1 %213  ;;  %v203_v10 = vpop.permute.xlu0 %202 }
  0x8e   : > { %217 = vst.msk [vmem:[#allocation3 + $0x8] sm:$0xff] %vm216_vm3, %v214_v8 }
  0x8f   : > { %206 = vst.msk [vmem:[#allocation3] sm:$0xff] %vm205_vm4, %v203_v10 }
  0x90   : > { %219 = vst.msk [vmem:[#allocation2] sm:$0xff] %vm196_vm0, %v203_v10 }
  0x95   : > { %v224_v11 = vld [vmem:[#allocation3 + $0x8] sm:$0xff] }
  0x96   : > { %v223_v12 = vld [vmem:[#allocation3] sm:$0xff] }
  0x97   : > { %v466_v13 = vpack.c.bf16 %v224_v11, %v223_v12 }
  0x99   : > { %467 = vmatpush3.bf16.msra.mxu0 %v466_v13  ;;  %470 = vmatpush3.bf16.msra.mxu1 %v466_v13 }
  0x9a   : > { %469 = vmatprep.subr.mxu1 %v620_v0  ;;  %454 = vmatprep.subr.mxu0 %v620_v0 }
  0x9d   : > { %471 = vmatpush3.msra.mxu1 %v191_v2  ;;  %455 = vmatpush3.msra.mxu0 %v191_v2 }
  0x9e   : > { %460 = vmatmul.mubr.msk.f32.vlgmr.msra.gmra.mrb[0].mxu1 %vm244_vm5, %v221_v14  ;;  %457 = vmatmul.mubr.msk.f32.vlgmr.msra.gmra.mrb[0].mxu0 %vm244_vm5, %v220_v15  ;;  %v237_v17 = vpop.permute.xlu1 %236  ;;  %v232_v28 = vpop.permute.xlu0 %231 }
  0x9f   : > { %462 = vmatprep.mubr.msk.f32.mxu1 %vm625_vm1, %v620_v0 }
  0xa2   : > { %463 = vmatmul.mubr.msk.f32.gmra.mrb[2].mxu1 %vm244_vm5, %v222_v16  ;;  %v242_v31 = vpop.permute.xlu1 %241 }
 0x171   : > { %v325_v18 = vpop.f32.mrb[0].mxu1  ;;  %v320_v19 = vpop.f32.mrb[0].mxu0 }
 0x172   : > { %v326_v20 = vadd.f32 %v325_v18, %v237_v17  ;;  %v461_v21 = vpop.f32.mrb[1].mxu1  ;;  %v458_v22 = vpop.f32.mrb[1].mxu0  ;;  %v321_v29 = vadd.f32 %v320_v19, %v232_v28 }
 0x174   : > { %v439_v23 = vmul.f32 -1.442695, %v326_v20 }
 0x175   : > { %v330_v24 = vpop.f32.mrb[2].mxu1 }
 0x176   : > { %536 = vpow2.f32 %v439_v23  ;;  %v464_v25 = vpop.f32.mrb[3].mxu1  ;;  %v331_v32 = vadd.f32 %v330_v24, %v242_v31 }
 0x180   : > { %v537_v26 = vpop.eup %536 }
 0x181   : > { %v337_v27 = vadd.f32 1.0, %v537_v26 }
 0x183   : > { %538 = vrcp.f32 %v337_v27 }
 0x18d   : > { %v539_v30 = vpop.eup %538 }
 0x18e   : > { %v340_v33 = vmul.f32 %v539_v30, %v321_v29 }
 0x190   : > { %v341_v34 = vadd.f32 %v340_v33, %v331_v32 }
 0x192   : > { %342 = vst [vmem:[%s183_s5] sm:$0xff] %v341_v34 }
 0x193   : > { %553 = shalt.err (!%p550_p5)
}
 0x194   : > { %s554_s21 = scalar_lea.hbm %s737_s9, 128  ;;  %s558_s27 = scalar_lea.hbm %s787_s3, 256 }
 0x195   : > { %p555_p6 = scmp.ne.s32.totalorder %s737_s9, %s554_s21  ;;  %p559_p10 = scmp.lt.u32.totalorder %s737_s9, %s787_s3 }
 0x196   : > { %p560_p11 = scmp.lt.u32.totalorder %s558_s27, %s554_s21  ;;  %p562_p13 = scmp.lt.u32.totalorder %s554_s21, %s737_s9 }
 0x197   : > { %p556_p7 = pnand %p555_p6, %p688_p4 }
 0x198   : > { %p561_p12 = por %p560_p11, %p559_p10 }
 0x199   : > { %p557_p9 = pneg %p556_p7 }
 0x19a   : > { %p563_p0 = por %p562_p13, %p561_p12 }
 0x19c   : > { %p564_p1 = pnand %p563_p0, %p557_p9 }
 0x19e   : > { %567 = shalt.err (!%p564_p1)
}
 0x19f   : > { %472 = dma.vmem_to_hbm [thread:$0]  (%p688_p4), %s739_s6, 128, %s737_s9, %s344_s10  }
 0x1a0 PF: > { %p478_p2 = scmp.ge.s32.totalorder %s618_s17, 2  ;;  %s370_s30 = sand.u32 1, %s598_s12  }
 0x1a1   : > { %s371_s4 = scalar_lea.sflag [#allocation5], %s370_s30 }
 0x1a2   : > { %p475_p3 = pnand %p478_p2, %p695_p8 }
 0x1a4   : > { %593 = dma.done.wait (!%p475_p3), %s371_s4, 128  }
 0x1a5   : > { %595 = vsyncadd (!%p475_p3), %s371_s4, 4294967168  ;;  %s16_s17 = sadd.s32 1, %s618_s17   ;;  %s790_s12 = smov %s602_s13 }
 0x1a6   : > { %p13_p5 = scmp.ge.s32.totalorder %s16_s17, 4   ;;  %s791_s13 = smov %s606_s14 }
 0x1a7   : > { %s792_s14 = smov %s701_s25  ;;  %s793_s15 = smov %s614_s16 }
 0x1a8   : > { %s794_s16 = smov %s796_s20  ;;  %15 = sbr.rel (!%p13_p5) target bundleno = 4 (0x4), region = 71 }
 0x1af   :  { %376 = vsyncpa [#allocation5], 1 }
 0x1b0   :  { %378 = vsyncpa [#allocation5 + $0x1], 1 }

</bundles_post_ra>
